<compile_context>
chip_gen: v7x
topology: tpu7x:2x2x1
jax: 0.10.0
libtpu: 0.0.40
codegen_flags: <defaults>
</compile_context>

<pallas_src>
import functools

import jax
import jax.numpy as jnp
from jax import lax
from jax.experimental import pallas as pl
from jax.experimental.pallas import tpu as pltpu

EPS = 1e-5
F32 = jnp.float32
BF16 = jnp.bfloat16

_VMEM_LIMIT = 32 * 1024 * 1024  # per-step working set is only a few MiB; safe on v5e/v6e/v7x


def _round_up(v, m):
    return ((v + m - 1) // m) * m


def _pick_tile(n_pad):
    """Largest point-tile in {1024,512,256,128} dividing n_pad (n_pad is a multiple of 128)."""
    for t in (1024, 512, 256, 128):
        if n_pad % t == 0:
            return t
    return 128


# --------------------------------------------------------------------------- kernels


def _xstats_kernel(x_ref, gram_ref):
    """Accumulate the (k_pad, k_pad) Gram of the augmented input tile (gives BN1 stats)."""
    t = pl.program_id(1)
    x = x_ref[0]                                                   # (k_pad, tile_n) f32
    g = lax.dot_general(x, x, (((1,), (1,)), ((), ())),
                        preferred_element_type=F32)                # (k_pad, k_pad)

    @pl.when(t == 0)
    def _():
        gram_ref[0] = g

    @pl.when(t != 0)
    def _():
        gram_ref[0] += g


def _bn1_apply_stats2_kernel(x_ref, w1_ref, s1_ref, o1_ref, cs_ref, gram_ref, *,
                             n_valid, has_tail):
    """Recompute conv1 -> BN1+ReLU; accumulate colsum / 64x64 Gram of h1n (gives BN2 stats)."""
    t = pl.program_id(1)
    x = x_ref[0]                                                   # (k_pad, tile_n)
    h1 = lax.dot_general(x, w1_ref[...], (((0,), (0,)), ((), ())),
                         preferred_element_type=F32)               # (tile_n, 64)
    h1n = jnp.maximum(h1 * s1_ref[...] + o1_ref[...], 0.0)
    if has_tail:
        rows = h1n.shape[0]
        valid = (lax.broadcasted_iota(jnp.int32, (rows, 1), 0) + t * rows) < n_valid
        h1n = jnp.where(valid, h1n, 0.0)
    h1nb = h1n.astype(BF16)
    g = lax.dot_general(h1nb, h1nb, (((0,), (0,)), ((), ())),
                        preferred_element_type=F32)                # (64, 64) on the MXU
    cs = jnp.sum(h1nb.astype(F32), axis=0, keepdims=True)          # (1, 64)

    @pl.when(t == 0)
    def _():
        cs_ref[0] = cs
        gram_ref[0] = g

    @pl.when(t != 0)
    def _():
        cs_ref[0] += cs
        gram_ref[0] += g


def _conv3_pool_kernel(x_ref, w1_ref, s1_ref, o1_ref, w2_ref, s2_ref, o2_ref, w3_ref,
                       pool_ref, cs_ref, gram_ref, *, n_valid, has_tail):
    """Recompute conv1/BN1/conv2/BN2, run conv3, keep per-batch running max of pre-BN h3,
    and accumulate colsum / 128x128 Gram of h2n (gives BN3 stats via the MXU).

    The (tile_n, 1024) conv3 activation never leaves VMEM; BN3+ReLU commute with the
    max-pool for per-channel bn3 scale >= 0 and are applied to the pooled (B,1024) in the head.
    """
    t = pl.program_id(1)
    x = x_ref[0]
    h1 = lax.dot_general(x, w1_ref[...], (((0,), (0,)), ((), ())),
                         preferred_element_type=F32)               # (tile_n, 64)
    h1n = jnp.maximum(h1 * s1_ref[...] + o1_ref[...], 0.0)
    h2 = jnp.dot(h1n.astype(BF16), w2_ref[...], preferred_element_type=F32)  # (tile_n, 128)
    h2n = jnp.maximum(h2 * s2_ref[...] + o2_ref[...], 0.0)
    if has_tail:
        rows = h2n.shape[0]
        valid = (lax.broadcasted_iota(jnp.int32, (rows, 1), 0) + t * rows) < n_valid
        h2n = jnp.where(valid, h2n, 0.0)
    h2nb = h2n.astype(BF16)
    h3 = jnp.dot(h2nb, w3_ref[...], preferred_element_type=F32)    # (tile_n, 1024)
    g = lax.dot_general(h2nb, h2nb, (((0,), (0,)), ((), ())),
                        preferred_element_type=F32)                # (128, 128) on the MXU
    cs = jnp.sum(h2nb.astype(F32), axis=0, keepdims=True)          # (1, 128)
    if has_tail:
        h3 = jnp.where(valid, h3, -jnp.inf)                        # exclude padded points from max
    tmax = jnp.max(h3, axis=0, keepdims=True)                      # (1, 1024)

    @pl.when(t == 0)
    def _():
        pool_ref[...] = tmax
        cs_ref[0] = cs
        gram_ref[0] = g

    @pl.when(t != 0)
    def _():
        pool_ref[...] = jnp.maximum(pool_ref[...], tmax)
        cs_ref[0] += cs
        gram_ref[0] += g


def _bn_rows(x, gamma, beta):
    """Training-mode BN over rows (the batch axis), single-pass E[x^2]-E[x]^2, f32."""
    mean = jnp.mean(x, axis=0, keepdims=True)
    var = jnp.maximum(jnp.mean(x * x, axis=0, keepdims=True) - mean * mean, 0.0)
    return gamma * (x - mean) * lax.rsqrt(var + EPS) + beta


def _head_kernel(pool_ref, s3_ref, o3_ref,
                 w4_ref, g4_ref, b4_ref,
                 w5_ref, g5_ref, b5_ref,
                 w6_ref, fb3_ref, out_ref, *, batch, k):
    # BN3 + ReLU applied to the pooled pre-BN max (exact: per-channel monotone for scale>=0).
    p = jnp.maximum(pool_ref[...] * s3_ref[...] + o3_ref[...], 0.0)          # (B, 1024)
    f = jnp.dot(p.astype(BF16), w4_ref[...], preferred_element_type=F32)     # (B, 512)
    f = jnp.maximum(_bn_rows(f, g4_ref[...], b4_ref[...]), 0.0)
    f = jnp.dot(f.astype(BF16), w5_ref[...], preferred_element_type=F32)     # (B, 256)
    f = jnp.maximum(_bn_rows(f, g5_ref[...], b5_ref[...]), 0.0)
    m = jnp.dot(f.astype(BF16), w6_ref[...], preferred_element_type=F32) + fb3_ref[...]
    j = lax.broadcasted_iota(jnp.int32, (batch, k * k), 1)
    out_ref[...] = m + jnp.where(j % (k + 1) == 0, 1.0, 0.0).astype(F32)


# --------------------------------------------------------------------------- wrapper


def _fold_from_gram(gram, colsum, w, count, gamma, beta):
    """Training-mode BN (scale, shift) for y = h @ w, from h's Gram / column-sum.

    sum_n y[n,c]   = (colsum @ w)[c]
    sum_n y[n,c]^2 = (w^T gram w)[c,c]
    """
    s = colsum @ w
    q = jnp.sum(w * (gram @ w), axis=0, keepdims=True)
    mean = s / count
    # TODO(synk): E[x^2]-E[x]^2 in f32 can cancel when |mean| >> std; clamped to >= 0.
    var = jnp.maximum(q / count - mean * mean, 0.0)
    scale = gamma * lax.rsqrt(var + EPS)
    shift = beta - mean * scale
    return scale, shift


def init_params(key, k=3):
    """Deterministic synthetic parameters; shapes mirror the PyTorch Tnet.__init__."""
    ks = jax.random.split(key, 6)

    def w(kk_, shape):
        return (jax.random.normal(kk_, shape, F32) / jnp.sqrt(float(shape[-1]))).astype(F32)

    ones = lambda c: jnp.ones((c,), F32)
    zeros = lambda c: jnp.zeros((c,), F32)
    return {
        # conv biases and fc1/fc2 biases cancel exactly under training-mode BN (unused).
        "conv1_w": w(ks[0], (64, k)),      "conv1_b": zeros(64),
        "conv2_w": w(ks[1], (128, 64)),    "conv2_b": zeros(128),
        "conv3_w": w(ks[2], (1024, 128)),  "conv3_b": zeros(1024),
        "fc1_w": w(ks[3], (512, 1024)),    "fc1_b": zeros(512),
        "fc2_w": w(ks[4], (256, 512)),     "fc2_b": zeros(256),
        "fc3_w": w(ks[5], (k * k, 256)),   "fc3_b": zeros(k * k),
        "bn1_g": ones(64),   "bn1_b": zeros(64),
        "bn2_g": ones(128),  "bn2_b": zeros(128),
        "bn3_g": ones(1024), "bn3_b": zeros(1024),
        "bn4_g": ones(512),  "bn4_b": zeros(512),
        "bn5_g": ones(256),  "bn5_b": zeros(256),
    }


def tnet_forward(x, params, k=3):
    """x: (B, k, N) float32, same NCW layout as the PyTorch Conv1d input."""
    B, kk, N = x.shape
    assert kk == k
    k_pad = _round_up(k + 1, 8)      # +1 channel row holds the valid-point indicator
    ind_row = k
    N_pad = _round_up(N, 128)
    tile_n = _pick_tile(N_pad)
    T = N_pad // tile_n
    grid = (B, T)
    has_tail = (N_pad != N)
    cnt = float(B * N)

    # --- input / parameter plumbing (layout + dtype only) ---------------------------
    # Augmented channel-major input: rows 0..k-1 = coords, row k = valid indicator, rest 0.
    x_aug = jnp.concatenate(
        [x.astype(F32),
         jnp.ones((B, 1, N), F32),
         jnp.zeros((B, k_pad - k - 1, N), F32)], axis=1)
    x_p = jnp.pad(x_aug, ((0, 0), (0, 0), (0, N_pad - N)))          # (B, k_pad, N_pad)

    w1 = jnp.pad(params["conv1_w"].astype(F32), ((0, 0), (0, k_pad - k))).T  # (k_pad, 64)
    w2 = params["conv2_w"].T.astype(BF16)        # (64, 128)
    w3 = params["conv3_w"].T.astype(BF16)        # (128, 1024)
    w4 = params["fc1_w"].T.astype(BF16)          # (1024, 512)
    w5 = params["fc2_w"].T.astype(BF16)          # (512, 256)
    w6 = params["fc3_w"].T.astype(BF16)          # (256, k*k)
    fb3 = params["fc3_b"].reshape(1, k * k).astype(F32)
    row = lambda v: v.reshape(1, -1).astype(F32)
    g1, be1 = row(params["bn1_g"]), row(params["bn1_b"])
    g2, be2 = row(params["bn2_g"]), row(params["bn2_b"])
    g3, be3 = row(params["bn3_g"]), row(params["bn3_b"])
    g4, be4 = row(params["bn4_g"]), row(params["bn4_b"])
    g5, be5 = row(params["bn5_g"]), row(params["bn5_b"])
    # The max-pool/BN3 commutation requires bn3 scale = gamma*rsqrt(var+eps) >= 0 (default gamma=1).
    # TODO(synk): track a per-channel running min too if negative bn3 gammas must be supported.

    cp = pltpu.CompilerParams(
        dimension_semantics=("parallel", "arbitrary"),   # per-b stat blocks -> batch shards on v7x
        vmem_limit_bytes=_VMEM_LIMIT,
    )
    x_spec = pl.BlockSpec((1, k_pad, tile_n), lambda b, t: (b, 0, t))

    # --- pass A: x Gram (streams x once; gives BN1 batch statistics) ----------------
    gx_b = pl.pallas_call(
        _xstats_kernel,
        grid=grid,
        in_specs=[x_spec],
        out_specs=pl.BlockSpec((1, k_pad, k_pad), lambda b, t: (b, 0, 0)),
        out_shape=jax.ShapeDtypeStruct((B, k_pad, k_pad), F32),
        compiler_params=cp,
    )(x_p)
    gx = jnp.sum(gx_b, axis=0)                               # (k_pad, k_pad)
    colsum_x = gx[ind_row:ind_row + 1, :]                    # indicator row = per-channel sums
    s1, o1 = _fold_from_gram(gx, colsum_x, w1, cnt, g1, be1)

    # --- pass B: recompute conv1 -> BN1+ReLU; h1n Gram / colsum (gives BN2 stats) ---
    cs1_b, g1n_b = pl.pallas_call(
        functools.partial(_bn1_apply_stats2_kernel, n_valid=N, has_tail=has_tail),
        grid=grid,
        in_specs=[
            x_spec,
            pl.BlockSpec((k_pad, 64), lambda b, t: (0, 0)),
            pl.BlockSpec((1, 64), lambda b, t: (0, 0)),
            pl.BlockSpec((1, 64), lambda b, t: (0, 0)),
        ],
        out_specs=[
            pl.BlockSpec((1, 1, 64), lambda b, t: (b, 0, 0)),
            pl.BlockSpec((1, 64, 64), lambda b, t: (b, 0, 0)),
        ],
        out_shape=[
            jax.ShapeDtypeStruct((B, 1, 64), F32),
            jax.ShapeDtypeStruct((B, 64, 64), F32),
        ],
        compiler_params=cp,
    )(x_p, w1, s1, o1)
    s2, o2 = _fold_from_gram(jnp.sum(g1n_b, axis=0), jnp.sum(cs1_b, axis=0),
                             w2.astype(F32), cnt, g2, be2)

    # --- pass C: fused conv1/BN1/conv2/BN2 -> conv3 + max-pool + BN3 stats (Gram) ----
    pooled, cs2_b, g2n_b = pl.pallas_call(
        functools.partial(_conv3_pool_kernel, n_valid=N, has_tail=has_tail),
        grid=grid,
        in_specs=[
            x_spec,
            pl.BlockSpec((k_pad, 64), lambda b, t: (0, 0)),
            pl.BlockSpec((1, 64), lambda b, t: (0, 0)),
            pl.BlockSpec((1, 64), lambda b, t: (0, 0)),
            pl.BlockSpec((64, 128), lambda b, t: (0, 0)),
            pl.BlockSpec((1, 128), lambda b, t: (0, 0)),
            pl.BlockSpec((1, 128), lambda b, t: (0, 0)),
            pl.BlockSpec((128, 1024), lambda b, t: (0, 0)),
        ],
        out_specs=[
            pl.BlockSpec((1, 1024), lambda b, t: (b, 0)),
            pl.BlockSpec((1, 1, 128), lambda b, t: (b, 0, 0)),
            pl.BlockSpec((1, 128, 128), lambda b, t: (b, 0, 0)),
        ],
        out_shape=[
            jax.ShapeDtypeStruct((B, 1024), F32),
            jax.ShapeDtypeStruct((B, 1, 128), F32),
            jax.ShapeDtypeStruct((B, 128, 128), F32),
        ],
        compiler_params=cp,
    )(x_p, w1, s1, o1, w2, s2, o2, w3)
    s3, o3 = _fold_from_gram(jnp.sum(g2n_b, axis=0), jnp.sum(cs2_b, axis=0),
                             w3.astype(F32), cnt, g3, be3)

    # --- pass D: head (BN3+ReLU on pooled, fc1/fc2/fc3, + identity) ------------------
    head = pl.pallas_call(
        functools.partial(_head_kernel, batch=B, k=k),
        out_shape=jax.ShapeDtypeStruct((B, k * k), F32),
        in_specs=[pl.BlockSpec(memory_space=pltpu.MemorySpace.VMEM)] * 11,
        out_specs=pl.BlockSpec(memory_space=pltpu.MemorySpace.VMEM),
        compiler_params=pltpu.CompilerParams(vmem_limit_bytes=_VMEM_LIMIT),
    )(pooled, s3, o3, w4, g4, be4, w5, g5, be5, w6, fb3)

    return head.reshape(B, k, k)


if __name__ == "__main__":
    key = jax.random.PRNGKey(0)
    k_pts, k_init = jax.random.split(key)

    # N not a multiple of 128 -> exercises N-padding + tail masking + multi-tile accumulation.
    B, K, N = 2, 3, 320
    x = jax.random.normal(k_pts, (B, K, N), F32)
    params = init_params(k_init, k=K)

    out = jax.block_until_ready(tnet_forward(x, params, k=K))
    assert out.shape == (B, K, K)
    assert bool(jnp.all(jnp.isfinite(out)))
    print("KERNEL_OK")
</pallas_src>

<mosaic_0001>
module attributes {stable_mosaic.version = 11 : i64} {
  func.func @_xstats_kernel(%arg0: i32, %arg1: i32, %arg2: memref<1x8x128xf32, #tpu.memory_space<vmem>>, %arg3: memref<1x8x8xf32, #tpu.memory_space<vmem>>) attributes {dimension_semantics = [#tpu.dimension_semantics<parallel>, #tpu.dimension_semantics<arbitrary>], iteration_bounds = array<i64: 2, 3>, scalar_prefetch = 0 : i64, scratch_operands = 0 : i64, tpu.core_type = #tpu.core_type<tc>, window_params = [{transform_indices = @transform_0, window_bounds = array<i64: 1, 8, 128>}, {transform_indices = @transform_1, window_bounds = array<i64: 1, 8, 8>}]} {
    %c0 = arith.constant 0 : index
    %c0_0 = arith.constant 0 : index
    %c0_1 = arith.constant 0 : index
    %0 = vector.load %arg2[%c0, %c0_0, %c0_1] : memref<1x8x128xf32, #tpu.memory_space<vmem>>, vector<1x8x128xf32>
    %1 = vector.shape_cast %0 : vector<1x8x128xf32> to vector<8x128xf32>
    %cst = arith.constant dense<0.000000e+00> : vector<8x8xf32>
    %2 = tpu.matmul %1, %1, %cst {dimension_numbers = #tpu.dot_dimension_numbers<[1], [1], [0], [0], [0, 0, 1, 0], [], []>} : vector<8x128xf32>, vector<8x128xf32>, vector<8x8xf32> -> vector<8x8xf32>
    %c0_i32 = arith.constant 0 : i32
    %3 = arith.cmpi eq, %arg1, %c0_i32 : i32
    %4 = arith.extui %3 : i1 to i32
    %c0_i32_2 = arith.constant 0 : i32
    %5 = arith.cmpi ne, %4, %c0_i32_2 : i32
    scf.if %5 {
      %c0_5 = arith.constant 0 : index
      %c0_6 = arith.constant 0 : index
      %c0_7 = arith.constant 0 : index
      %9 = vector.load %arg3[%c0_5, %c0_6, %c0_7] : memref<1x8x8xf32, #tpu.memory_space<vmem>>, vector<1x8x8xf32>
      %10 = vector.shape_cast %9 : vector<1x8x8xf32> to vector<8x8xf32>
      %11 = vector.shape_cast %2 : vector<8x8xf32> to vector<1x8x8xf32>
      tpu.vector_store %arg3[%c0_5, %c0_6, %c0_7], %11 {strides = array<i32>} : memref<1x8x8xf32, #tpu.memory_space<vmem>>, vector<1x8x8xf32>,
    } else {
    }
    %c0_i32_3 = arith.constant 0 : i32
    %6 = arith.cmpi ne, %arg1, %c0_i32_3 : i32
    %7 = arith.extui %6 : i1 to i32
    %c0_i32_4 = arith.constant 0 : i32
    %8 = arith.cmpi ne, %7, %c0_i32_4 : i32
    scf.if %8 {
      %c0_5 = arith.constant 0 : index
      %c0_6 = arith.constant 0 : index
      %c0_7 = arith.constant 0 : index
      %9 = vector.load %arg3[%c0_5, %c0_6, %c0_7] : memref<1x8x8xf32, #tpu.memory_space<vmem>>, vector<1x8x8xf32>
      %10 = vector.shape_cast %9 : vector<1x8x8xf32> to vector<8x8xf32>
      %11 = arith.addf %10, %2 : vector<8x8xf32>
      %c0_8 = arith.constant 0 : index
      %c0_9 = arith.constant 0 : index
      %c0_10 = arith.constant 0 : index
      %12 = vector.load %arg3[%c0_8, %c0_9, %c0_10] : memref<1x8x8xf32, #tpu.memory_space<vmem>>, vector<1x8x8xf32>
      %13 = vector.shape_cast %12 : vector<1x8x8xf32> to vector<8x8xf32>
      %14 = vector.shape_cast %11 : vector<8x8xf32> to vector<1x8x8xf32>
      tpu.vector_store %arg3[%c0_8, %c0_9, %c0_10], %14 {strides = array<i32>} : memref<1x8x8xf32, #tpu.memory_space<vmem>>, vector<1x8x8xf32>,
    } else {
    }
    return
  }
  func.func @transform_0(%arg0: i32, %arg1: i32) -> (i32, i32, i32) {
    %c0_i32 = arith.constant 0 : i32
    %c0_i32_0 = arith.constant 0 : i32
    return %arg0, %c0_i32, %arg1 : i32, i32, i32
  }
  func.func @transform_1(%arg0: i32, %arg1: i32) -> (i32, i32, i32) {
    %c0_i32 = arith.constant 0 : i32
    %c0_i32_0 = arith.constant 0 : i32
    %c0_i32_1 = arith.constant 0 : i32
    return %arg0, %c0_i32, %c0_i32_0 : i32, i32, i32
  }
}

</mosaic_0001>

<bundles_post_ra>
// kernel: tpu_custom_call.1
= control target key start
LH: loop header
LB: loop body
LE: loop exit
PB: predicated region body
PF: predicated region fallthrough
CT: control target
= control target key end

     0   :  { %6 = vsyncpa [#allocation3], 0  ;;  %s837_s0 = inlined_call_operand.hbm [shape: f32[2,8,384], index: 0, kind: input, shape index: {}]   ;;  %s838_s1 = inlined_call_operand.hbm [shape: f32[2,8,8], index: 1, kind: output, shape index: {}]  }
   0x1   :  { %8 = vsyncpa [#allocation3 + $0x1], 0 }
   0x2   :  { %9 = vsyncpa [#allocation4], 0 }
   0x3   :  { %11 = vsyncpa [#allocation4 + $0x1], 0  ;;  %s625_s6 = smov 0   ;;  %s627_s7 = smov 0  }
   0x4   :  { %s629_s8 = smov 0   ;;  %s631_s9 = smov 0  }
   0x5   :  { %s633_s10 = smov 0   ;;  %s635_s11 = smov 0  }
   0x6   :  { %s637_s12 = smov 0   ;;  %s639_s13 = smov 0  }
   0x7   :  { %s641_s14 = smov 0   ;;  %s643_s15 = smov 0  }
   0x8   :  { %s645_s16 = smov 0  }
   0x9 LB: > { %s330_s17 = sadd.s32 4294967295, %s609_s16   ;;  %s331_s18 = sadd.s32 4294967294, %s609_s16   ;;  %s609_s16 = sphi %s645_s16, %s17_s16   ;;  %s605_s15 = sphi %s643_s15, %s857_s15   ;;  %s601_s14 = sphi %s641_s14, %s856_s14   ;;  %s597_s13 = sphi %s639_s13, %s855_s13   ;;  %s593_s12 = sphi %s637_s12, %s854_s12   ;;  %s589_s11 = sphi %s635_s11, %s853_s11   ;;  %s585_s10 = sphi %s633_s10, %s852_s10   ;;  %s581_s9 = sphi %s631_s9, %s851_s9   ;;  %s577_s8 = sphi %s629_s8, %s850_s8   ;;  %s573_s7 = sphi %s627_s7, %s849_s7   ;;  %s569_s6 = sphi %s625_s6, %s848_s6  }
   0xa   : > { %s26_s19 = sadd.s32 1, %s601_s14  ;;  %s29_s20 = sadd.s32 1, %s605_s15 }
   0xb   : > { %p27_p0 = scmp.ge.s32.totalorder %s26_s19, 3  ;;  %s38_s21 = sadd.s32 1, %s589_s11 }
   0xc   : > { %p45_p1 = scmp.ne.s32.totalorder %s589_s11, %s585_s10  ;;  %p46_p2 = scmp.eq.s32.totalorder %s609_s16, 0 }
   0xd   : > { %s859_s19 = smov (%p27_p0, %s26_s19), 0  ;;  %s861_s20 = smov (!%p27_p0, %s29_s20), %s605_s15 }
   0xe   : > { %s34_s22 = ssub.s32 %s601_s14, %s859_s19  ;;  %p691_p3 = por %p46_p2, %p45_p1 }
   0xf   : > { %p31_p4 = scmp.ge.s32.totalorder %s861_s20, 2  ;;  %p51_p5 = scmp.ne.s32.totalorder %s585_s10, %s581_s9 }
  0x10   : > { %p52_p6 = scmp.eq.s32.totalorder %s330_s17, 0  ;;  %s64_s24 = sadd.s32 1, %s577_s8 }
  0x11   : > { %s863_s20 = smov (%p31_p4, %s861_s20), 0  ;;  %p74_p8 = scmp.ne.s32.totalorder %s577_s8, %s573_s7 }
  0x12   : > { %p699_p7 = por %p52_p6, %p51_p5  ;;  %s33_s26 = ssub.s32 %s605_s15, %s863_s20 }
  0x13   : > { %p75_p9 = scmp.eq.s32.totalorder %s330_s17, 5  ;;  %s35_s27 = sor.u32 %s34_s22, %s33_s26 }
  0x14   : > { %p62_p10 = scmp.eq.s32.totalorder %s33_s26, 0  ;;  %p36_p11 = scmp.eq.s32.totalorder %s35_s27, 0 }
  0x15   : > { %p707_p12 = por %p75_p9, %p74_p8  ;;  %p80_p13 = scmp.ne.s32.totalorder %s573_s7, %s569_s6 }
  0x16   : > { %s712_s29 = scalar_select %p62_p10, %s577_s8, %s64_s24  }
  0x17   : > { %s842_s28 = scalar_select %p707_p12, 1, 0 }
  0x18   : > { %s715_s30 = scalar_select %p36_p11, %s589_s11, %s38_s21  }
  0x19   : > { %p81_p0 = scmp.eq.s32.totalorder %s331_s18, 5  ;;  %p365_p1 = scmp.lt.s32.totalorder %s609_s16, 6 }
  0x1a   : > { %s101_s3 = sand.u32 1, %s589_s11   ;;  %s352_s5 = smul.u32 3, %s605_s15 }
  0x1b   : > { %p720_p2 = por %p81_p0, %p80_p13  ;;  %s334_s4 = sshll.u32 %s101_s3, 3 }
  0x1c   : > { %s105_s9 = scalar_lea.vmem [#allocation2], %s334_s4  ;;  %p728_p4 = pnand %p365_p1, %p691_p3 }
  0x1d   : > { %s843_s2 = scalar_select %p720_p2, 1, 0 }
  0x1e   : > { %s114_s17 = sshll.u32 %s105_s9, 4  ;;  %s110_s21 = sadd.s32 %s601_s14, %s352_s5  ;;  %s733_s17 = int_to_ptr.vmem [resolvable:$true] %s114_s17 }
  0x1f   : > { %s335_s18 = sshll.u32 %s110_s21, 7  ;;  %s102_s23 = scalar_lea.sflag [#allocation3], %s101_s3 }
  0x20   : > { %s738_s27 = scalar_lea.hbm %s837_s0, %s335_s18  ;;  %p459_p6 = pneg %p728_p4 }
  0x21   : > { %s457_s4 = scalar_lea.hbm %s738_s27, 128  ;;  %s462_s21 = scalar_lea.hbm %s837_s0, 768 }
  0x22   : > { %p458_p3 = scmp.ne.s32.totalorder %s738_s27, %s457_s4  ;;  %p463_p10 = scmp.lt.u32.totalorder %s738_s27, %s837_s0 }
  0x23   : > { %p464_p11 = scmp.lt.u32.totalorder %s462_s21, %s457_s4  ;;  %p466_p0 = scmp.lt.u32.totalorder %s457_s4, %s738_s27 }
  0x24   : > { %p460_p8 = pnand %p459_p6, %p458_p3 }
  0x25   : > { %p465_p13 = por %p464_p11, %p463_p10 }
  0x26   : > { %p461_p9 = pneg %p460_p8 }
  0x27   : > { %p467_p1 = por %p466_p0, %p465_p13 }
  0x29   : > { %p468_p5 = pnand %p467_p1, %p461_p9 }
  0x2b   : > { %471 = shalt.err (!%p468_p5)
}
  0x2c   : > { %s472_s3 = scalar_lea.vmem %s733_s17, 128  ;;  %s611_s26 = smov [#allocation2]  }
  0x2d   : > { %p473_p3 = scmp.ne.s32.totalorder %s733_s17, %s472_s3  ;;  %s477_s5 = sshll.u32 %s611_s26, 4  ;;  %s478_s5 = int_to_ptr.vmem [resolvable:$false] %s477_s5 }
  0x2e   : > { %s479_s9 = scalar_lea.vmem %s478_s5, 256  ;;  %p480_p12 = scmp.lt.s32.totalorder %s733_s17, %s478_s5 }
  0x2f   : > { %p475_p8 = pnand %p473_p3, %p459_p6  ;;  %p481_p10 = scmp.lt.s32.totalorder %s479_s9, %s472_s3 }
  0x31   : > { %p476_p2 = pneg %p475_p8  ;;  %p482_p11 = por %p481_p10, %p480_p12 }
  0x33   : > { %p483_p13 = pnand %p482_p11, %p476_p2 }
  0x35   : > { %486 = shalt.err (!%p483_p13)
}
  0x36   : > { %360 = dma.hbm_to_vmem [thread:$0]  (!%p728_p4), %s738_s27, 128, %s733_s17, %s102_s23  }
  0x37   : > { %p119_p5 = scmp.lt.s32.totalorder %s609_s16, 7  ;;  %p845_p9 = scmp.ge.s32.totalorder %s609_s16, 1 }
  0x39   : > { %p120_p6 = pnand %p845_p9, %p119_p5 }
  0x3a   : > { %s125_s4 = sand.u32 (!%p120_p6), 1, %s585_s10  }
  0x3b   : > { %123 = sbr.rel (%p120_p6) target bundleno = 320 (0x140), region = 24  ;;  %s337_s21 = sshll.u32 (!%p120_p6), %s125_s4, 3 }
  0x3c   : > { %s126_s18 = scalar_lea.sflag (!%p120_p6), [#allocation3], %s125_s4  ;;  %s129_s24 = scalar_lea.vmem (!%p120_p6), [#allocation2], %s337_s21 }
  0x42   : > { %560 = dma.done.wait (%p699_p7), %s126_s18, 128  }
  0x43   : > { %562 = vsyncadd (%p699_p7), %s126_s18, 4294967168  ;;  %s145_s22 = sand.u32 1, %s573_s7   ;;  %v612_v0 = vmov 0.0   ;;  %vm613_vm0 = vmmov 0   ;;  %v148_v1 = vld [vmem:[%s129_s24] sm:$0xff]  ;;  %p339_p12 = scmp.ne.s32.totalorder %s593_s12, 0 }
  0x44   : > { %s338_s3 = sshll.u32 %s145_s22, 3  ;;  %347 = vmatprep.subr.mxu0 %v612_v0  ;;  %349 = vmatprep.mubr.msk.f32.mxu0 %vm613_vm0, %v612_v0  ;;  %vm223_vm1 = vcmask (!%p339_p12), 64512  }
  0x45   : > { %348 = vmatpush3.xpose.msra.mxu0 %v148_v1  ;;  %s147_s17 = scalar_lea.vmem [#allocation5], %s338_s3 }
  0x48   : > { %350 = vmatmul.mubr.f32.vlgmr.msra.gmra.mrb[0].mxu0 %v148_v1 }
 0x116   : > { %222 = sbr.rel (%p339_p12) target bundleno = 285 (0x11d), region = 32 }
 0x11b   : > { %v215_v2 = vpop.f32.mrb[0].mxu0 }
 0x11c   : > { %v351_v3 = vpop.f32.mrb[1].mxu0  ;;  %224 = vst.msk [vmem:[%s147_s17] sm:$0xff] (!%p339_p12), %vm223_vm1, %v215_v2 }
 0x11d PF: > { %p340_p7 = scmp.eq.s32.totalorder %s593_s12, 0 }
 0x11e   : > { %vm231_vm2 = vcmask (!%p340_p7), 64512  }
 0x11f   : > { %228 = sbr.rel (%p340_p7) target bundleno = 295 (0x127), region = 36 }
 0x123   : > { %v229_v4 = vld [vmem:[%s147_s17] sm:$0xff] (!%p340_p7) }
 0x124   : > { %v230_v5 = vadd.f32 (!%p340_p7), %v229_v4, %v215_v2 }
 0x126   : > { %232 = vst.msk [vmem:[%s147_s17] sm:$0xff] %vm231_vm2, %v230_v5 }
 0x127 PF: > { %s342_s25 = sshll.u32 %s597_s13, 7  ;;  %s247_s5 = sshll.u32 %s147_s17, 4  ;;  %s248_s5 = int_to_ptr.vmem [resolvable:$true] %s247_s5 }
 0x128   : > { %s781_s26 = scalar_lea.hbm %s838_s1, %s342_s25  ;;  %s234_s9 = scalar_lea.sflag [#allocation4], %s145_s22 }
 0x129   : > { %s487_s4 = scalar_lea.vmem %s248_s5, 128  ;;  %p846_p4 = scmp.ne.s32.totalorder %s842_s28, 0 }
 0x12a   : > { %p488_p2 = scmp.ne.s32.totalorder %s248_s5, %s487_s4  ;;  %s614_s12 = smov [#allocation5]  }
 0x12b   : > { %s491_s21 = sshll.u32 %s614_s12, 4  ;;  %s492_s21 = int_to_ptr.vmem [resolvable:$false] %s491_s21 }
 0x12c   : > { %p489_p0 = pnand %p488_p2, %p846_p4  ;;  %s493_s18 = scalar_lea.vmem %s492_s21, 256 }
 0x12d   : > { %p494_p3 = scmp.lt.s32.totalorder %s248_s5, %s492_s21  ;;  %p495_p8 = scmp.lt.s32.totalorder %s493_s18, %s487_s4 }
 0x12e   : > { %p490_p1 = pneg %p489_p0 }
 0x12f   : > { %p496_p10 = por %p495_p8, %p494_p3 }
 0x131   : > { %p497_p11 = pnand %p496_p10, %p490_p1 }
 0x133   : > { %500 = shalt.err (!%p497_p11)
}
 0x134   : > { %s501_s13 = scalar_lea.hbm %s781_s26, 128  ;;  %s505_s3 = scalar_lea.hbm %s838_s1, 256 }
 0x135   : > { %p502_p13 = scmp.ne.s32.totalorder %s781_s26, %s501_s13  ;;  %p506_p6 = scmp.lt.u32.totalorder %s781_s26, %s838_s1 }
 0x136   : > { %p507_p12 = scmp.lt.u32.totalorder %s505_s3, %s501_s13  ;;  %p509_p2 = scmp.lt.u32.totalorder %s501_s13, %s781_s26 }
 0x137   : > { %p503_p5 = pnand %p502_p13, %p846_p4 }
 0x138   : > { %p508_p7 = por %p507_p12, %p506_p6 }
 0x139   : > { %p504_p9 = pneg %p503_p5 }
 0x13a   : > { %p510_p0 = por %p509_p2, %p508_p7 }
 0x13c   : > { %p511_p1 = pnand %p510_p0, %p504_p9 }
 0x13e   : > { %514 = shalt.err (!%p511_p1)
}
 0x13f   : > { %355 = dma.vmem_to_hbm [thread:$0]  (%p846_p4), %s248_s5, 128, %s781_s26, %s234_s9  }
 0x140 PF: > { %p366_p3 = scmp.ge.s32.totalorder %s609_s16, 2  ;;  %s259_s27 = sand.u32 1, %s569_s6  }
 0x141   : > { %p847_p8 = scmp.ne.s32.totalorder %s843_s2, 0  ;;  %s260_s23 = scalar_lea.sflag [#allocation4], %s259_s27 }
 0x143   : > { %p362_p10 = pnand %p366_p3, %p847_p8 }
 0x145   : > { %564 = dma.done.wait (!%p362_p10), %s260_s23, 128  }
 0x146   : > { %566 = vsyncadd (!%p362_p10), %s260_s23, 4294967168  ;;  %s17_s16 = sadd.s32 1, %s609_s16   ;;  %s848_s6 = smov %s573_s7 }
 0x147   : > { %p14_p11 = scmp.ge.s32.totalorder %s17_s16, 8   ;;  %s849_s7 = smov %s577_s8 }
 0x148   : > { %s850_s8 = smov %s712_s29  ;;  %s851_s9 = smov %s585_s10 }
 0x149   : > { %s852_s10 = smov %s589_s11  ;;  %s853_s11 = smov %s715_s30 }
 0x14a   : > { %s854_s12 = smov %s601_s14  ;;  %s855_s13 = smov %s605_s15 }
 0x14b   : > { %s856_s14 = smov %s859_s19  ;;  %s857_s15 = smov %s863_s20 }
 0x14c   :  { %16 = sbr.rel (!%p14_p11) target bundleno = 9 (0x9), region = 77 }
 0x153   :  { %265 = vsyncpa [#allocation3], 1 }
 0x154   :  { %267 = vsyncpa [#allocation3 + $0x1], 1 }
 0x155   :  { %268 = vsyncpa [#allocation4], 1 }
 0x156   :  { %270 = vsyncpa [#allocation4 + $0x1], 1 }

</bundles_post_ra>
